<compile_context>
chip_gen: v5e
topology: v5e:2x2
jax: 0.10.0
libtpu: 0.0.40
codegen_flags: <defaults>
</compile_context>

<pallas_src>
import jax
import jax.numpy as jnp
from jax.experimental import pallas as pl
from jax.experimental.pallas import tpu as pltpu


def depth_kernel(xw_ref, m_ref, o_ref):
    # xw_ref: (2, 4) f32 in SMEM. Row 0 = view-matrix row 2 (-> z),
    #         row 1 = view-matrix row 3 (-> w).
    # m_ref : (C, TR, 128) f32 in VMEM, C in {4, 3}. m_ref[c] is a dense
    #         (TR, 128) slab of homogeneous component c for TR*128 gaussians.
    # o_ref : (TR, 128) f32 in VMEM — depth tile.
    m0 = m_ref[0]
    m1 = m_ref[1]
    m2 = m_ref[2]

    z = xw_ref[0, 0] * m0 + xw_ref[0, 1] * m1 + xw_ref[0, 2] * m2
    w = xw_ref[1, 0] * m0 + xw_ref[1, 1] * m1 + xw_ref[1, 2] * m2

    if m_ref.shape[0] == 4:
        # General homogeneous 4th row read from HBM.
        m3 = m_ref[3]
        z = z + xw_ref[0, 3] * m3
        w = w + xw_ref[1, 3] * m3
    else:
        # 4th row known to be all-ones: fold it into scalar constants.
        z = z + xw_ref[0, 3]
        w = w + xw_ref[1, 3]

    # EUP approximate reciprocal + one VPU Newton step (~f32-exact).
    inv_w = pl.reciprocal(w, approx=True)
    inv_w = inv_w * (2.0 - w * inv_w)

    o_ref[...] = z * inv_w


def _generation_config():
    """Per-generation tiling defaults, detected from device_kind (safe fallback)."""
    kind = ""
    try:
        kind = str(jax.devices()[0].device_kind).lower()
    except Exception:
        pass
    if "v5" in kind:
        # 16 MiB scoped-VMEM default, ~0.8 TB/s: small steps already amortise
        # the per-step overhead; larger tiles risk the scoped limit.
        return dict(tile_rows=1024, num_tc=1, vmem_limit_bytes=None)
    if "v6" in kind:
        # ~1.3-1.4 TB/s, 32 MiB scoped default: ~10 MiB double-buffered set.
        return dict(tile_rows=2048, num_tc=1, vmem_limit_bytes=None)
    if "v7" in kind or "7x" in kind:
        # ~3.2 TB/s per TC, 2 TensorCores, 64 MiB physical VMEM: bigger steps
        # plus a raised scoped limit; grid forced even so both TCs work.
        return dict(tile_rows=4096, num_tc=2, vmem_limit_bytes=48 << 20)
    return dict(tile_rows=2048, num_tc=1, vmem_limit_bytes=None)


def _round_up(x, m):
    return ((x + m - 1) // m) * m


def _pick_tiling(n_rows, target_rows, num_tc):
    """Choose (tile_rows, grid).

    Tile is capped at target_rows, kept a multiple of 8 (sublane), and a cdiv
    grid handles a ragged trailing block for any n_rows — never decays to tiny
    tiles nor to a single oversized block.  On multi-TC chips the grid is
    forced to a multiple of num_tc so the "parallel" axis load-balances.
    """
    if n_rows <= 8:
        return n_rows, 1
    tr = min(target_rows, n_rows)
    if tr < n_rows:
        tr = max(8, (tr // 8) * 8)
    grid = pl.cdiv(n_rows, tr)
    if num_tc > 1 and (grid < num_tc or grid % num_tc != 0):
        grid = max(num_tc, _round_up(grid, num_tc))
        tr = max(8, _round_up(pl.cdiv(n_rows, grid), 8))
        grid = pl.cdiv(n_rows, tr)
    return tr, grid


def depth_forward(x, means_hom_tmp, *, tile_rows=None, w_is_one=False):
    """x: (1, 4, 4) f32; means_hom_tmp: (1, 4, N) f32.  Returns depth (1, N).

    w_is_one=True asserts means_hom_tmp[:, 3, :] == 1 (true for the module's
    construction cat([means, ones]).T): the all-ones row is then not read from
    HBM.  In the real model means_hom_tmp is a fixed buffer, so the 3-row slab
    prep below is a one-time cost amortised over all forward calls.
    """
    assert x.shape[0] == 1 and means_hom_tmp.shape[0] == 1, "bmm batch must be 1"
    assert x.shape[1:] == (4, 4) and means_hom_tmp.shape[1] == 4
    x2d = x[0].astype(jnp.float32)          # (4, 4)
    m2d = means_hom_tmp[0].astype(jnp.float32)  # (4, N)
    N = m2d.shape[1]
    assert N % 128 == 0, "N must be a multiple of 128 (lane width)"
    n_rows = N // 128

    cfg = _generation_config()
    target = cfg["tile_rows"] if tile_rows is None else tile_rows
    tr, grid_n = _pick_tiling(n_rows, target, cfg["num_tc"])

    m3d = m2d.reshape(4, n_rows, 128)       # free row-major reshape
    if w_is_one:
        m3d = m3d[:3]                       # drop the all-ones homogeneous row
    n_comp = m3d.shape[0]
    coef = x2d[2:4, :]                      # (2, 4): rows 2 (z) and 3 (w)

    elems = n_rows * 128
    cost = pl.CostEstimate(
        flops=18 * elems,
        transcendentals=elems,
        bytes_accessed=(4 * n_comp + 4) * elems,
    )

    out2d = pl.pallas_call(
        depth_kernel,
        out_shape=jax.ShapeDtypeStruct((n_rows, 128), jnp.float32),
        grid_spec=pltpu.PrefetchScalarGridSpec(
            num_scalar_prefetch=0,
            grid=(grid_n,),
            in_specs=[
                # Tiny scalar operand: whole (2, 4) array lives in SMEM.
                pl.BlockSpec(memory_space=pltpu.MemorySpace.SMEM),
                # Dense tile of gaussian homogeneous coordinates.
                pl.BlockSpec((n_comp, tr, 128), lambda i: (0, i, 0)),
            ],
            out_specs=pl.BlockSpec((tr, 128), lambda i: (i, 0)),
        ),
        compiler_params=pltpu.CompilerParams(
            dimension_semantics=("parallel",),
            vmem_limit_bytes=cfg["vmem_limit_bytes"]),
        cost_estimate=cost,
    )(coef, m3d)

    return out2d.reshape(1, N)              # free reshape back to (1, N)


def depth_forward_ref(x, means_hom_tmp):
    # Pure-JAX reference mirroring the PyTorch forward exactly.
    means_cam_hom = jnp.matmul(x, means_hom_tmp)             # (1, 4, N)
    means_cam_hom = jnp.transpose(means_cam_hom, (0, 2, 1))  # (1, N, 4)
    means_cam = means_cam_hom[:, :, :3] / means_cam_hom[:, :, 3:4]
    return means_cam[:, :, 2]                                # (1, N)


def _build_inputs(key, N):
    k_means, k_rot, k_t = jax.random.split(key, 3)
    # means_hom_tmp: (1, 4, N) homogeneous gaussian means, transposed.
    means = jax.random.uniform(k_means, (N, 3), jnp.float32, -1.0, 1.0)
    means_hom = jnp.concatenate([means, jnp.ones((N, 1), jnp.float32)], axis=1)
    means_hom_tmp = means_hom.T[None, :, :]                  # (1, 4, N)
    # x: (1, 4, 4) view-matrix-like rigid transform with [0,0,0,1] bottom row.
    ang = jax.random.uniform(k_rot, (), jnp.float32, 0.0, 1.0)
    c, s = jnp.cos(ang), jnp.sin(ang)
    R = jnp.array([[c, -s, 0.0],
                   [s,  c, 0.0],
                   [0.0, 0.0, 1.0]], jnp.float32)
    T = jax.random.uniform(k_t, (3, 1), jnp.float32, -0.5, 0.5) + jnp.array(
        [[0.0], [0.0], [3.0]], jnp.float32)
    top = jnp.concatenate([R, T], axis=1)
    bottom = jnp.array([[0.0, 0.0, 0.0, 1.0]], jnp.float32)
    x = jnp.concatenate([top, bottom], axis=0)[None, :, :]   # (1, 4, 4)
    return x, means_hom_tmp


if __name__ == "__main__":
    key = jax.random.PRNGKey(0)

    # Small synthetic size: N = 2048 gaussians, batch B = 1 (bmm constraint).
    N = 2048
    x, means_hom_tmp = _build_inputs(key, N)
    ref = depth_forward_ref(x, means_hom_tmp)

    # 1) Default (generation-tiled) path.
    out = jax.block_until_ready(depth_forward(x, means_hom_tmp))
    assert out.shape == ref.shape == (1, N)
    assert jnp.allclose(out, ref, atol=1e-5, rtol=1e-5), (
        float(jnp.max(jnp.abs(out - ref))))

    # 2) Force a small tile to exercise the multi-step (pipelined) grid path.
    out2 = jax.block_until_ready(depth_forward(x, means_hom_tmp, tile_rows=8))
    assert jnp.allclose(out2, ref, atol=1e-5, rtol=1e-5), (
        float(jnp.max(jnp.abs(out2 - ref))))

    # 3) w-row-is-ones fast path (valid here: means_hom = cat([means, 1])).
    out3 = jax.block_until_ready(depth_forward(x, means_hom_tmp, w_is_one=True))
    assert jnp.allclose(out3, ref, atol=1e-5, rtol=1e-5), (
        float(jnp.max(jnp.abs(out3 - ref))))

    # 4) Awkward N (n_rows = 17, not a multiple of the tile): exercises the
    #    cdiv grid with a ragged trailing block.
    N2 = 128 * 17
    x2, mh2 = _build_inputs(jax.random.PRNGKey(0), N2)
    ref2 = depth_forward_ref(x2, mh2)
    out4 = jax.block_until_ready(depth_forward(x2, mh2, tile_rows=8))
    assert out4.shape == (1, N2)
    assert jnp.allclose(out4, ref2, atol=1e-5, rtol=1e-5), (
        float(jnp.max(jnp.abs(out4 - ref2))))

    print("KERNEL_OK")
</pallas_src>

<mosaic_0001>
module attributes {stable_mosaic.version = 11 : i64} {
  func.func @depth_kernel(%arg0: i32, %arg1: memref<2x4xf32, #tpu.memory_space<smem>>, %arg2: memref<4x16x128xf32, #tpu.memory_space<vmem>>, %arg3: memref<16x128xf32, #tpu.memory_space<vmem>>) attributes {dimension_semantics = [#tpu.dimension_semantics<parallel>], iteration_bounds = array<i64: 1>, scalar_prefetch = 0 : i64, scratch_operands = 0 : i64, tpu.core_type = #tpu.core_type<tc>, window_params = [{transform_indices = @transform_0, window_bounds = array<i64: 2, 4>}, {transform_indices = @transform_1, window_bounds = array<i64: 4, 16, 128>}, {transform_indices = @transform_2, window_bounds = array<i64: 16, 128>}]} {
    %c0 = arith.constant 0 : index
    %c0_0 = arith.constant 0 : index
    %c0_1 = arith.constant 0 : index
    %0 = vector.load %arg2[%c0, %c0_0, %c0_1] : memref<4x16x128xf32, #tpu.memory_space<vmem>>, vector<1x16x128xf32>
    %1 = vector.shape_cast %0 : vector<1x16x128xf32> to vector<16x128xf32>
    %c1 = arith.constant 1 : index
    %c0_2 = arith.constant 0 : index
    %c0_3 = arith.constant 0 : index
    %2 = vector.load %arg2[%c1, %c0_2, %c0_3] : memref<4x16x128xf32, #tpu.memory_space<vmem>>, vector<1x16x128xf32>
    %3 = vector.shape_cast %2 : vector<1x16x128xf32> to vector<16x128xf32>
    %c2 = arith.constant 2 : index
    %c0_4 = arith.constant 0 : index
    %c0_5 = arith.constant 0 : index
    %4 = vector.load %arg2[%c2, %c0_4, %c0_5] : memref<4x16x128xf32, #tpu.memory_space<vmem>>, vector<1x16x128xf32>
    %5 = vector.shape_cast %4 : vector<1x16x128xf32> to vector<16x128xf32>
    %c0_6 = arith.constant 0 : index
    %c0_7 = arith.constant 0 : index
    %6 = memref.load %arg1[%c0_6, %c0_7] : memref<2x4xf32, #tpu.memory_space<smem>>
    %7 = vector.broadcast %6 : f32 to vector<16x128xf32>
    %8 = arith.mulf %7, %1 : vector<16x128xf32>
    %c0_8 = arith.constant 0 : index
    %c1_9 = arith.constant 1 : index
    %9 = memref.load %arg1[%c0_8, %c1_9] : memref<2x4xf32, #tpu.memory_space<smem>>
    %10 = vector.broadcast %9 : f32 to vector<16x128xf32>
    %11 = arith.mulf %10, %3 : vector<16x128xf32>
    %12 = arith.addf %8, %11 : vector<16x128xf32>
    %c0_10 = arith.constant 0 : index
    %c2_11 = arith.constant 2 : index
    %13 = memref.load %arg1[%c0_10, %c2_11] : memref<2x4xf32, #tpu.memory_space<smem>>
    %14 = vector.broadcast %13 : f32 to vector<16x128xf32>
    %15 = arith.mulf %14, %5 : vector<16x128xf32>
    %16 = arith.addf %12, %15 : vector<16x128xf32>
    %c1_12 = arith.constant 1 : index
    %c0_13 = arith.constant 0 : index
    %17 = memref.load %arg1[%c1_12, %c0_13] : memref<2x4xf32, #tpu.memory_space<smem>>
    %18 = vector.broadcast %17 : f32 to vector<16x128xf32>
    %19 = arith.mulf %18, %1 : vector<16x128xf32>
    %c1_14 = arith.constant 1 : index
    %c1_15 = arith.constant 1 : index
    %20 = memref.load %arg1[%c1_14, %c1_15] : memref<2x4xf32, #tpu.memory_space<smem>>
    %21 = vector.broadcast %20 : f32 to vector<16x128xf32>
    %22 = arith.mulf %21, %3 : vector<16x128xf32>
    %23 = arith.addf %19, %22 : vector<16x128xf32>
    %c1_16 = arith.constant 1 : index
    %c2_17 = arith.constant 2 : index
    %24 = memref.load %arg1[%c1_16, %c2_17] : memref<2x4xf32, #tpu.memory_space<smem>>
    %25 = vector.broadcast %24 : f32 to vector<16x128xf32>
    %26 = arith.mulf %25, %5 : vector<16x128xf32>
    %27 = arith.addf %23, %26 : vector<16x128xf32>
    %c3 = arith.constant 3 : index
    %c0_18 = arith.constant 0 : index
    %c0_19 = arith.constant 0 : index
    %28 = vector.load %arg2[%c3, %c0_18, %c0_19] : memref<4x16x128xf32, #tpu.memory_space<vmem>>, vector<1x16x128xf32>
    %29 = vector.shape_cast %28 : vector<1x16x128xf32> to vector<16x128xf32>
    %c0_20 = arith.constant 0 : index
    %c3_21 = arith.constant 3 : index
    %30 = memref.load %arg1[%c0_20, %c3_21] : memref<2x4xf32, #tpu.memory_space<smem>>
    %31 = vector.broadcast %30 : f32 to vector<16x128xf32>
    %32 = arith.mulf %31, %29 : vector<16x128xf32>
    %33 = arith.addf %16, %32 : vector<16x128xf32>
    %c1_22 = arith.constant 1 : index
    %c3_23 = arith.constant 3 : index
    %34 = memref.load %arg1[%c1_22, %c3_23] : memref<2x4xf32, #tpu.memory_space<smem>>
    %35 = vector.broadcast %34 : f32 to vector<16x128xf32>
    %36 = arith.mulf %35, %29 : vector<16x128xf32>
    %37 = arith.addf %27, %36 : vector<16x128xf32>
    %38 = tpu.reciprocal %37 {approx = true} : vector<16x128xf32> -> vector<16x128xf32>
    %39 = arith.mulf %37, %38 : vector<16x128xf32>
    %cst = arith.constant 2.000000e+00 : f32
    %40 = vector.broadcast %cst : f32 to vector<16x128xf32>
    %41 = arith.subf %40, %39 : vector<16x128xf32>
    %42 = arith.mulf %38, %41 : vector<16x128xf32>
    %43 = arith.mulf %33, %42 : vector<16x128xf32>
    %c0_24 = arith.constant 0 : index
    %c0_25 = arith.constant 0 : index
    %44 = vector.load %arg3[%c0_24, %c0_25] : memref<16x128xf32, #tpu.memory_space<vmem>>, vector<16x128xf32>
    tpu.vector_store %arg3[%c0_24, %c0_25], %43 {strides = array<i32>} : memref<16x128xf32, #tpu.memory_space<vmem>>, vector<16x128xf32>,
    return
  }
  func.func @transform_0(%arg0: i32) -> (i32, i32) {
    %c0_i32 = arith.constant 0 : i32
    %c0_i32_0 = arith.constant 0 : i32
    %c0_i32_1 = arith.constant 0 : i32
    return %c0_i32, %c0_i32_0 : i32, i32
  }
  func.func @transform_1(%arg0: i32) -> (i32, i32, i32) {
    %c0_i32 = arith.constant 0 : i32
    %c0_i32_0 = arith.constant 0 : i32
    %c0_i32_1 = arith.constant 0 : i32
    return %c0_i32, %arg0, %c0_i32_0 : i32, i32, i32
  }
  func.func @transform_2(%arg0: i32) -> (i32, i32) {
    %c0_i32 = arith.constant 0 : i32
    %c0_i32_0 = arith.constant 0 : i32
    return %arg0, %c0_i32 : i32, i32
  }
}

</mosaic_0001>

<bundles_post_ra>
// kernel: tpu_custom_call.1
= control target key start
LH: loop header
LB: loop body
LE: loop exit
PB: predicated region body
PF: predicated region fallthrough
CT: control target
= control target key end

     0   :  { %7 = vsyncpa [#allocation5], 0  ;;  %s254_s0 = inlined_call_operand.hbm [shape: f32[2,4], index: 0, kind: input, shape index: {}]   ;;  %s255_s1 = inlined_call_operand.hbm [shape: f32[4,16,128], index: 1, kind: input, shape index: {}]   ;;  %s256_s2 = inlined_call_operand.hbm [shape: f32[16,128], index: 2, kind: output, shape index: {}]  }
   0x1   :  { %8 = vsyncpa [#allocation3], 0 }
   0x2   :  { %9 = vsyncpa [#allocation4], 0  ;;  %s15_s11 = sshll.u32 %s254_s0, 4  ;;  %s23_s14 = sshll.u32 %s255_s1, 4  ;;  %s16_s11 = int_to_ptr.hbm [resolvable:$true] %s15_s11  ;;  %s24_s14 = int_to_ptr.hbm [resolvable:$true] %s23_s14 }
   0x3   :  { %s210_s15 = smov [#allocation2]   ;;  %s211_s16 = smov [#allocation6]  }
   0x4   :  { %18 = dma.hbm_to_smem %s16_s11, 32, %s210_s15, [#allocation5]  }
   0x5   :  { %s25_s17 = sshll.u32 %s211_s16, 4  ;;  %s212_s18 = smov 128   ;;  %s26_s17 = int_to_ptr.vmem [resolvable:$true] %s25_s17 }
   0x6   :  { %s213_s19 = smov 8  }
   0x7   :  { %31 = dma.hbm_to_vmem [thread:$0]  %s24_s14, 1024, %s26_s17, [#allocation3], %s212_s18, %s212_s18, %s213_s19  }
   0x8   :  { %204 = dma.done.wait [#allocation5], 32  }
   0x9   :  { %205 = vsyncadd [#allocation5], 4294967264 }
   0xa   :  { %206 = dma.done.wait [#allocation3], 1024  }
   0xb   :  { %207 = vsyncadd [#allocation3], 4294966272 }
   0xc   :  { %40 = sfence }
   0xd   :  { %s239_s0 = sld [smem:[#allocation2]]  ;;  %v41_v0 = vld [vmem:[#allocation6] sm:$0xff]  ;;  %v44_v1 = vld [vmem:[#allocation6 + $0x10] sm:$0xff]  ;;  %v42_v2 = vld [vmem:[#allocation6 + $0x8] sm:$0xff]  ;;  %s214_s26 = smov [#allocation7]  }
   0xe   :  { %s241_s1 = sld [smem:[#allocation2 + $0x1]]  ;;  %v45_v3 = vld [vmem:[#allocation6 + $0x18] sm:$0xff]  ;;  %v47_v4 = vld [vmem:[#allocation6 + $0x20] sm:$0xff]  ;;  %v82_v10 = vld [vmem:[#allocation6 + $0x30] sm:$0xff]  ;;  %s112_s27 = sshll.u32 %s214_s26, 4  ;;  %s113_s27 = int_to_ptr.vmem [resolvable:$true] %s112_s27 }
   0xf   :  { %s130_s20 = sld [smem:[#allocation2 + $0x80]]  ;;  %v48_v11 = vld [vmem:[#allocation6 + $0x28] sm:$0xff]  ;;  %v83_v14 = vld [vmem:[#allocation6 + $0x38] sm:$0xff]  ;;  %s114_s30 = sshll.u32 %s256_s2, 4  ;;  %s115_s30 = int_to_ptr.hbm [resolvable:$true] %s114_s30 }
  0x10   :  { %s131_s21 = sld [smem:[#allocation2 + $0x81]] }
  0x11   :  { %s132_s22 = sld [smem:[#allocation2 + $0x82]] }
  0x12   :  { %s134_s23 = sld [smem:[#allocation2 + $0x83]] }
  0x13   :  { %s243_s24 = sld [smem:[#allocation2 + $0x2]]  ;;  %v50_v15 = vstv %s239_s0 }
  0x14   :  { %v54_v17 = vstv %s241_s1  ;;  %s133_s25 = sld [smem:[#allocation2 + $0x3]]  ;;  %v51_v25 = vmul.f32 %v50_v15, %v41_v0  ;;  %v52_v30 = vmul.f32 %v50_v15, %v42_v2 }
  0x15   :  { %v66_v5 = vstv %s130_s20  ;;  %v55_v26 = vmul.f32 %v54_v17, %v44_v1  ;;  %v56_v31 = vmul.f32 %v54_v17, %v45_v3 }
  0x16   :  { %v67_v6 = vmul.f32 %v66_v5, %v41_v0  ;;  %v70_v7 = vstv %s131_s21  ;;  %v68_v12 = vmul.f32 %v66_v5, %v42_v2 }
  0x17   :  { %v71_v8 = vmul.f32 %v70_v7, %v44_v1  ;;  %v76_v9 = vstv %s132_s22  ;;  %v72_v13 = vmul.f32 %v70_v7, %v45_v3  ;;  %v57_v33 = vadd.f32 %v55_v26, %v51_v25 }
  0x18   :  { %v77_v16 = vmul.f32 %v76_v9, %v47_v4  ;;  %v91_v19 = vstv %s134_s23  ;;  %v78_v22 = vmul.f32 %v76_v9, %v48_v11  ;;  %v58_v36 = vadd.f32 %v56_v31, %v52_v30 }
  0x19   :  { %v73_v18 = vadd.f32 %v71_v8, %v67_v6  ;;  %v74_v20 = vadd.f32 %v72_v13, %v68_v12  ;;  %v92_v21 = vmul.f32 %v91_v19, %v82_v10  ;;  %v93_v23 = vmul.f32 %v91_v19, %v83_v14 }
  0x1a   :  { %v60_v28 = vstv %s243_s24  ;;  %v85_v35 = vstv %s133_s25 }
  0x1b   :  { %v79_v24 = vadd.f32 %v77_v16, %v73_v18  ;;  %v80_v27 = vadd.f32 %v78_v22, %v74_v20  ;;  %v61_v34 = vmul.f32 %v60_v28, %v47_v4  ;;  %v62_v37 = vmul.f32 %v60_v28, %v48_v11 }
  0x1c   :  { %v86_v39 = vmul.f32 %v85_v35, %v82_v10  ;;  %v87_v42 = vmul.f32 %v85_v35, %v83_v14 }
  0x1d   :  { %v94_v29 = vadd.f32 %v92_v21, %v79_v24  ;;  %v95_v32 = vadd.f32 %v93_v23, %v80_v27  ;;  %v63_v38 = vadd.f32 %v61_v34, %v57_v33  ;;  %v64_v41 = vadd.f32 %v62_v37, %v58_v36 }
  0x1f   :  { %140 = vrcp.f32 %v94_v29  ;;  %v88_v46 = vadd.f32 %v86_v39, %v63_v38  ;;  %v89_v48 = vadd.f32 %v87_v42, %v64_v41 }
  0x20   :  { %142 = vrcp.f32 %v95_v32 }
  0x25   :  { %v141_v40 = vpop.eup %140 }
  0x26   :  { %v143_v43 = vpop.eup %142  ;;  %v98_v44 = vmul.f32 %v141_v40, %v94_v29 }
  0x27   :  { %v99_v45 = vmul.f32 %v143_v43, %v95_v32 }
  0x28   :  { %v100_v47 = vsub.f32 2.0, %v98_v44 }
  0x29   :  { %v101_v49 = vsub.f32 2.0, %v99_v45 }
  0x2a   :  { %v102_v50 = vmul.f32 %v141_v40, %v100_v47 }
  0x2b   :  { %v103_v51 = vmul.f32 %v143_v43, %v101_v49 }
  0x2c   :  { %v104_v52 = vmul.f32 %v102_v50, %v88_v46 }
  0x2d   :  { %v105_v53 = vmul.f32 %v103_v51, %v89_v48 }
  0x2e   :  { %106 = vst [vmem:[#allocation7] sm:$0xff] %v104_v52 }
  0x2f   :  { %107 = vst [vmem:[#allocation7 + $0x8] sm:$0xff] %v105_v53 }
  0x30   :  { %120 = dma.vmem_to_hbm [thread:$0]  %s113_s27, 256, %s115_s30, [#allocation4], %s212_s18, %s212_s18, %s213_s19  }
  0x31   :  { %208 = dma.done.wait [#allocation4], 256  }
  0x32   :  { %209 = vsyncadd [#allocation4], 4294967040 }
  0x33   :  { %125 = vsyncpa [#allocation3], 1 }
  0x34   :  { %126 = vsyncpa [#allocation4], 1 }
  0x35   :  { %127 = vsyncpa [#allocation5], 1 }

</bundles_post_ra>
